<compile_context>
chip_gen: v7x
topology: tpu7x:2x2x1
jax: 0.10.0
libtpu: 0.0.40
codegen_flags: <defaults>
</compile_context>

<pallas_src>
import numpy as np
import jax
import jax.numpy as jnp
from jax import lax
from jax.experimental import pallas as pl
from jax.experimental.pallas import tpu as pltpu


# ---------------- parameter setup (host-side glue, not the hot path) ---------

def gram_schmidt(vectors):
    # vectors: (n, 1, h, w) numpy -> orthonormal set w.r.t. full-tensor dot
    out = []
    for x in vectors:
        x = x.copy()
        for y in out:
            x = x - (x * y).sum() / (y * y).sum() * y
        x = x / np.sqrt((x * x).sum())
        out.append(x)
    return np.stack(out)


def initialize_orthogonal_filters(c, h, w, key):
    if h * w < c:
        n = c // (h * w)
        keys = jax.random.split(key, n)
        grams = []
        for i in range(n):
            r = np.asarray(jax.random.uniform(keys[i], (h * w, 1, h, w),
                                              dtype=jnp.float32))
            grams.append(gram_schmidt(r))
        return np.concatenate(grams, axis=0)
    else:
        r = np.asarray(jax.random.uniform(key, (c, 1, h, w), dtype=jnp.float32))
        return gram_schmidt(r)


# ---------------- adaptive-pool folding (host-side, linear op) ---------------

def _adaptive_pool_matrix_1d(in_size, out_size):
    """P[out, in] such that pooled = P @ raw (PyTorch adaptive_avg_pool bins)."""
    P = np.zeros((out_size, in_size), dtype=np.float32)
    for i in range(out_size):
        s = (i * in_size) // out_size
        e = -((-(i + 1) * in_size) // out_size)          # ceil((i+1)*in/out)
        P[i, s:e] = 1.0 / (e - s)
    return P


def _fold_adaptive_pool_into_filter(f_flat, H, W, h, w):
    """f_flat: (C, H*W).  Returns effective filter (C, h*w) acting on raw x."""
    if (h, w) == (H, W):
        return jnp.asarray(f_flat, jnp.float32)
    Ph = _adaptive_pool_matrix_1d(h, H)                  # (H, h)
    Pw = _adaptive_pool_matrix_1d(w, W)                  # (W, w)
    P = np.kron(Ph, Pw)                                  # (H*W, h*w), row-major
    return jnp.asarray(f_flat, jnp.float32) @ jnp.asarray(P)


# ---------------- generation-aware sizing ------------------------------------

def _tpu_config():
    """Per-generation tiling defaults: x-block byte target, scoped-VMEM cap,
    number of TensorCores reachable via the 'parallel' grid split."""
    try:
        kind = jax.devices()[0].device_kind.lower()
    except Exception:                                    # pragma: no cover
        kind = ""
    if "v7" in kind or "7x" in kind:
        # 64 MiB physical VMEM, ~3.2 TB/s HBM: bigger blocks, tight cap.
        return dict(num_tc=2, block_bytes=12 << 20, vmem_cap=48 << 20)
    if "v6" in kind:
        return dict(num_tc=1, block_bytes=12 << 20, vmem_cap=64 << 20)
    if "v5e" in kind or "v5 lite" in kind or "v5lite" in kind:
        # v5e default scoped VMEM is 16 MiB -> must raise it explicitly.
        return dict(num_tc=1, block_bytes=8 << 20, vmem_cap=48 << 20)
    return dict(num_tc=1, block_bytes=8 << 20, vmem_cap=40 << 20)


def _pick_tc(C, bytes_per_channel_row, x_block_budget):
    """Channel tile.  Only split when even an 8-row batch tile over all C
    channels blows the per-buffer VMEM budget.  The output block is (tb, tc),
    so tc must be a multiple of 128 (lane rule) that divides C."""
    if 8 * C * bytes_per_channel_row <= x_block_budget:
        return C
    divs = [d for d in range(128, C, 128) if C % d == 0]
    for d in sorted(divs, reverse=True):
        if 8 * d * bytes_per_channel_row <= x_block_budget:
            return d
    if divs:
        return divs[0]                                   # best effort
    # TODO(synk): C not a multiple of 128 and too large to fit untiled ->
    # would need a transposed (tc, tb) output layout to tile channels legally.
    return C


def _pick_tb(B, per_b_bytes, x_block_budget, num_tc):
    """Batch rows per grid step: largest sublane-aligned tile whose x block
    fits the per-buffer budget.  On multi-TC parts (v7x) also aim for an even
    number of grid steps so the 'parallel' axis splits evenly across cores."""
    cap = int(x_block_budget // max(per_b_bytes, 1))
    cap = max(1, min(cap, B))
    if cap < B:
        cap = max(8, (cap // 8) * 8)                     # (8,128) sublane rule
        cap = min(cap, B)

    if num_tc <= 1 or B < 2 * num_tc * 8:
        return cap                                       # v5e/v6e: biggest fit

    want = 2 * num_tc if B >= 4 * num_tc * 8 else num_tc
    best_even, best_any = None, None
    t = cap if (cap % 8 == 0) else max(8, (cap // 8) * 8)
    while t >= 8:
        nb = -(-B // t)
        if nb >= want:
            if best_any is None:
                best_any = t
            if nb % num_tc == 0:
                best_even = t
                break
        t -= 8
    return best_even or best_any or cap


# ---------------- Pallas kernel: fused multiply + spatial reduction ----------

def _gst_kernel(filt_ref, x_ref, o_ref):
    # filt_ref: (tc, hw) f32    x_ref: (tb, tc, hw)    o_ref: (tb, tc) f32
    filt = filt_ref[...]                                 # hoisted, loaded once
    tb = x_ref.shape[0]

    def row(i, carry):
        xi = x_ref[i].astype(jnp.float32)                # one row in f32 only
        o_ref[i, :] = jnp.sum(filt * xi, axis=-1)
        return carry

    lax.fori_loop(0, tb, row, 0, unroll=(tb <= 8))


def gram_schmidt_transform(x, constant_filter, *, block_bytes=None,
                           vmem_limit_bytes=None):
    """Equivalent of GramSchmidtTransform.forward.  x: (B, C, h, w) -> (B, C, 1, 1)."""
    B, C, h, w = x.shape
    Cf, H, W = constant_filter.shape
    assert C == Cf
    hw = h * w

    cfg = _tpu_config()
    if block_bytes is None:
        block_bytes = cfg["block_bytes"]

    # Fold adaptive_avg_pool2d into the filter (pooling is linear).
    f_flat = jnp.asarray(constant_filter, jnp.float32).reshape(C, H * W)
    f_eff = _fold_adaptive_pool_into_filter(f_flat, H, W, h, w)     # (C, hw)

    x_flat = x.reshape(B, C, hw)                 # keep incoming dtype

    # --- tile sizing with lane/sublane-padded extents ------------------------
    itemsize = x_flat.dtype.itemsize
    hw_pad = -(-hw // 128) * 128                 # lane padding
    sub = max(8, 32 // itemsize)                 # sublane packing (f32:8, bf16:16)

    bytes_per_chan_row = hw_pad * itemsize
    tc = _pick_tc(C, bytes_per_chan_row, block_bytes)
    tc_pad = -(-tc // sub) * sub
    per_b_bytes = tc_pad * hw_pad * itemsize
    tb = _pick_tb(B, per_b_bytes, block_bytes, cfg["num_tc"])

    nb = pl.cdiv(B, tb)
    nc = C // tc

    # --- explicit scoped-VMEM limit: 2x (double-buffer) each operand + margin
    x_blk = tb * tc_pad * hw_pad * itemsize
    filt_blk = (-(-tc // 8) * 8) * hw_pad * 4
    out_blk = (-(-tb // 8) * 8) * max(-(-tc // 128) * 128, 128) * 4
    needed = 2 * (x_blk + filt_blk + out_blk) + (2 << 20)
    if vmem_limit_bytes is None:
        vmem_limit_bytes = int(min(cfg["vmem_cap"], max(32 << 20, needed)))

    out = pl.pallas_call(
        _gst_kernel,
        out_shape=jax.ShapeDtypeStruct((B, C), jnp.float32),
        grid_spec=pltpu.PrefetchScalarGridSpec(
            num_scalar_prefetch=0,
            grid=(nc, nb),                       # channel outer, batch inner
            in_specs=[
                pl.BlockSpec((tc, hw), lambda c, b: (c, 0)),        # filter
                pl.BlockSpec((tb, tc, hw), lambda c, b: (b, c, 0)),  # x block
            ],
            out_specs=pl.BlockSpec((tb, tc), lambda c, b: (b, c)),   # lane-dense
        ),
        compiler_params=pltpu.CompilerParams(
            dimension_semantics=("parallel", "parallel"),
            vmem_limit_bytes=int(vmem_limit_bytes)),
    )(f_eff, x_flat)
    return out.reshape(B, C, 1, 1)


if __name__ == "__main__":
    key = jax.random.PRNGKey(0)
    k_filt, k_x = jax.random.split(key)

    C, H = 32, 8          # module build params: GramSchmidtTransform(c=32, h=8)
    B, h_in = 2, 16       # input spatial 16 != 8 -> exercises the pooling fold

    constant_filter = jnp.asarray(
        initialize_orthogonal_filters(C, H, H, k_filt).reshape(C, H, H),
        dtype=jnp.float32)
    x = jax.random.normal(k_x, (B, C, h_in, h_in), dtype=jnp.float32)

    out = gram_schmidt_transform(x, constant_filter)
    out = jax.block_until_ready(out)

    # pure-JAX reference: adaptive pool (evenly divisible -> block mean) + dot
    x_pooled = x.reshape(B, C, H, h_in // H, H, h_in // H).mean(axis=(3, 5))
    ref = (constant_filter[None] * x_pooled).sum(axis=(-1, -2), keepdims=True)

    assert out.shape == (B, C, 1, 1)
    np.testing.assert_allclose(np.asarray(out), np.asarray(ref),
                               rtol=1e-5, atol=1e-5)
    print("KERNEL_OK")
</pallas_src>

<mosaic_0001>
module attributes {stable_mosaic.version = 11 : i64} {
  func.func @_gst_kernel(%arg0: i32, %arg1: i32, %arg2: memref<32x256xf32, #tpu.memory_space<vmem>>, %arg3: memref<2x32x256xf32, #tpu.memory_space<vmem>>, %arg4: memref<2x32xf32, #tpu.memory_space<vmem>>) attributes {dimension_semantics = [#tpu.dimension_semantics<parallel>, #tpu.dimension_semantics<parallel>], iteration_bounds = array<i64: 1, 1>, scalar_prefetch = 0 : i64, scratch_operands = 0 : i64, tpu.core_type = #tpu.core_type<tc>, window_params = [{transform_indices = @transform_0, window_bounds = array<i64: 32, 256>}, {transform_indices = @transform_1, window_bounds = array<i64: 2, 32, 256>}, {transform_indices = @transform_2, window_bounds = array<i64: 2, 32>}]} {
    %c0 = arith.constant 0 : index
    %c0_0 = arith.constant 0 : index
    %0 = vector.load %arg2[%c0, %c0_0] : memref<32x256xf32, #tpu.memory_space<vmem>>, vector<32x256xf32>
    %c0_i32 = arith.constant 0 : i32
    %1 = arith.index_cast %c0_i32 : i32 to index
    %c0_1 = arith.constant 0 : index
    %c0_2 = arith.constant 0 : index
    %2 = vector.load %arg3[%1, %c0_1, %c0_2] : memref<2x32x256xf32, #tpu.memory_space<vmem>>, vector<1x32x256xf32>
    %3 = vector.shape_cast %2 : vector<1x32x256xf32> to vector<32x256xf32>
    %4 = arith.mulf %0, %3 : vector<32x256xf32>
    %cst = arith.constant dense<0.000000e+00> : vector<32xf32>
    %5 = vector.multi_reduction <add>, %4, %cst [1] : vector<32x256xf32> to vector<32xf32>
    %6 = arith.index_cast %c0_i32 : i32 to index
    %c0_3 = arith.constant 0 : index
    %7 = vector.load %arg4[%6, %c0_3] : memref<2x32xf32, #tpu.memory_space<vmem>>, vector<1x32xf32>
    %8 = vector.shape_cast %7 : vector<1x32xf32> to vector<32xf32>
    %9 = vector.shape_cast %5 : vector<32xf32> to vector<1x32xf32>
    tpu.vector_store %arg4[%6, %c0_3], %9 {strides = array<i32>} : memref<2x32xf32, #tpu.memory_space<vmem>>, vector<1x32xf32>,
    %c1_i32 = arith.constant 1 : i32
    %10 = arith.index_cast %c1_i32 : i32 to index
    %c0_4 = arith.constant 0 : index
    %c0_5 = arith.constant 0 : index
    %11 = vector.load %arg3[%10, %c0_4, %c0_5] : memref<2x32x256xf32, #tpu.memory_space<vmem>>, vector<1x32x256xf32>
    %12 = vector.shape_cast %11 : vector<1x32x256xf32> to vector<32x256xf32>
    %13 = arith.mulf %0, %12 : vector<32x256xf32>
    %cst_6 = arith.constant dense<0.000000e+00> : vector<32xf32>
    %14 = vector.multi_reduction <add>, %13, %cst_6 [1] : vector<32x256xf32> to vector<32xf32>
    %15 = arith.index_cast %c1_i32 : i32 to index
    %c0_7 = arith.constant 0 : index
    %16 = vector.load %arg4[%15, %c0_7] : memref<2x32xf32, #tpu.memory_space<vmem>>, vector<1x32xf32>
    %17 = vector.shape_cast %16 : vector<1x32xf32> to vector<32xf32>
    %18 = vector.shape_cast %14 : vector<32xf32> to vector<1x32xf32>
    tpu.vector_store %arg4[%15, %c0_7], %18 {strides = array<i32>} : memref<2x32xf32, #tpu.memory_space<vmem>>, vector<1x32xf32>,
    %c2_i32 = arith.constant 2 : i32
    return
  }
  func.func @transform_0(%arg0: i32, %arg1: i32) -> (i32, i32) {
    %c0_i32 = arith.constant 0 : i32
    %c0_i32_0 = arith.constant 0 : i32
    return %arg0, %c0_i32 : i32, i32
  }
  func.func @transform_1(%arg0: i32, %arg1: i32) -> (i32, i32, i32) {
    %c0_i32 = arith.constant 0 : i32
    %c0_i32_0 = arith.constant 0 : i32
    return %arg1, %arg0, %c0_i32 : i32, i32, i32
  }
  func.func @transform_2(%arg0: i32, %arg1: i32) -> (i32, i32) {
    %c0_i32 = arith.constant 0 : i32
    return %arg1, %arg0 : i32, i32
  }
}

</mosaic_0001>

<bundles_post_ra>
// kernel: tpu_custom_call.1
= control target key start
LH: loop header
LB: loop body
LE: loop exit
PB: predicated region body
PF: predicated region fallthrough
CT: control target
= control target key end

     0   :  { %7 = vsyncpa [#allocation3], 0  ;;  %s313_s0 = inlined_call_operand.hbm [shape: f32[32,256], index: 0, kind: input, shape index: {}]   ;;  %s314_s1 = inlined_call_operand.hbm [shape: f32[2,32,256], index: 1, kind: input, shape index: {}]   ;;  %s315_s2 = inlined_call_operand.hbm [shape: f32[2,32], index: 2, kind: output, shape index: {}]  }
   0x1   :  { %8 = vsyncpa [#allocation6], 0 }
   0x2   :  { %9 = vsyncpa [#allocation4], 0  ;;  %s257_s9 = smov [#allocation2]   ;;  %s185_s13 = scalar_lea.hbm %s313_s0, 1024 }
   0x3   :  { %s15_s10 = sshll.u32 %s257_s9, 4  ;;  %p186_p0 = scmp.ne.s32.totalorder %s313_s0, %s185_s13  ;;  %s16_s10 = int_to_ptr.vmem [resolvable:$true] %s15_s10 }
   0x4   :  { %p189_p1 = scmp.lt.u32.totalorder %s185_s13, %s313_s0 }
   0x6   :  { %p191_p2 = pnand %p189_p1, %p186_p0 }
   0x8   :  { %194 = shalt.err (!%p191_p2)
}
   0x9   :  { %s195_s18 = scalar_lea.vmem %s16_s10, 1024  ;;  %p200_p4 = scmp.lt.s32.totalorder %s16_s10, %s16_s10 }
   0xa   :  { %p196_p3 = scmp.ne.s32.totalorder %s16_s10, %s195_s18  ;;  %p201_p5 = scmp.lt.s32.totalorder %s195_s18, %s195_s18 }
   0xc   :  { %p202_p6 = por %p201_p5, %p200_p4 }
   0xe   :  { %p203_p7 = pnand %p202_p6, %p196_p3 }
  0x10   :  { %206 = shalt.err (!%p203_p7)
}
  0x11   :  { %s258_s19 = smov 256   ;;  %s259_s20 = smov 16  }
  0x12   :  { %21 = dma.hbm_to_vmem [thread:$0]  %s313_s0, 1024, %s16_s10, [#allocation3], %s258_s19, %s258_s19, %s259_s20  }
  0x13   :  { %s260_s23 = smov [#allocation5]   ;;  %s207_s27 = scalar_lea.hbm %s314_s1, 2048 }
  0x14   :  { %s27_s24 = sshll.u32 %s260_s23, 4  ;;  %p208_p8 = scmp.ne.s32.totalorder %s314_s1, %s207_s27  ;;  %s28_s24 = int_to_ptr.vmem [resolvable:$true] %s27_s24 }
  0x15   :  { %p211_p9 = scmp.lt.u32.totalorder %s207_s27, %s314_s1 }
  0x17   :  { %p213_p10 = pnand %p211_p9, %p208_p8 }
  0x19   :  { %216 = shalt.err (!%p213_p10)
}
  0x1a   :  { %s217_s4 = scalar_lea.vmem %s28_s24, 2048  ;;  %p222_p12 = scmp.lt.s32.totalorder %s28_s24, %s28_s24 }
  0x1b   :  { %p218_p11 = scmp.ne.s32.totalorder %s28_s24, %s217_s4  ;;  %p223_p13 = scmp.lt.s32.totalorder %s217_s4, %s217_s4 }
  0x1d   :  { %p224_p0 = por %p223_p13, %p222_p12 }
  0x1f   :  { %p225_p1 = pnand %p224_p0, %p218_p11 }
  0x21   :  { %228 = shalt.err (!%p225_p1)
}
  0x22   :  { %33 = dma.hbm_to_vmem [thread:$0]  %s314_s1, 2048, %s28_s24, [#allocation6], %s258_s19, %s258_s19, %s259_s20  }
  0x23   :  { %251 = dma.done.wait [#allocation3], 1024  }
  0x24   :  { %252 = vsyncadd [#allocation3], 4294966272 }
  0x25   :  { %253 = dma.done.wait [#allocation6], 2048  }
  0x26   :  { %254 = vsyncadd [#allocation6], 4294965248  ;;  %v40_v0 = vld [vmem:[#allocation2] sm:$0xff]  ;;  %v41_v1 = vld [vmem:[#allocation2 + $0x8] sm:$0xff]  ;;  %v80_v48 = vlaneseq  ;;  %vm91_vm0 = vcmask 130112   ;;  %vm98_vm1 = vcmask 195712  }
  0x27   :  { %v111_v2 = vld [vmem:[#allocation5 + $0x40] sm:$0xff]  ;;  %v112_v3 = vld [vmem:[#allocation5 + $0x48] sm:$0xff]  ;;  %v42_v10 = vld [vmem:[#allocation2 + $0x10] sm:$0xff]  ;;  %s261_s1 = smov [#allocation7]   ;;  %vm105_vm2 = vcmask 261312   ;;  %vm108_vm3 = vcmask 253952  }
  0x28   :  { %v119_v4 = vmul.f32 %v111_v2, %v40_v0  ;;  %v48_v5 = vld [vmem:[#allocation5] sm:$0xff]  ;;  %v49_v6 = vld [vmem:[#allocation5 + $0x8] sm:$0xff]  ;;  %v120_v7 = vmul.f32 %v112_v3, %v41_v1  ;;  %v43_v11 = vld [vmem:[#allocation2 + $0x18] sm:$0xff]  ;;  %v81_v49 = vand.u32 127, %v80_v48  ;;  %v83_v54 = vshrl.u32 %v80_v48, 7  ;;  %s170_s6 = sshll.u32 %s261_s1, 4  ;;  %s171_s6 = int_to_ptr.vmem [resolvable:$true] %s170_s6 }
  0x29   :  { %v56_v8 = vmul.f32 %v48_v5, %v40_v0  ;;  %v57_v9 = vmul.f32 %v49_v6, %v41_v1  ;;  %v113_v12 = vld [vmem:[#allocation5 + $0x50] sm:$0xff]  ;;  %v114_v13 = vld [vmem:[#allocation5 + $0x58] sm:$0xff]  ;;  %v44_v21 = vld [vmem:[#allocation2 + $0x20] sm:$0xff]  ;;  %s229_s7 = scalar_lea.vmem %s171_s6, 32  ;;  %p234_p3 = scmp.lt.s32.totalorder %s171_s6, %s171_s6 }
  0x2a   :  { %v121_v14 = vmul.f32 %v113_v12, %v42_v10  ;;  %v50_v15 = vld [vmem:[#allocation5 + $0x10] sm:$0xff]  ;;  %v51_v16 = vld [vmem:[#allocation5 + $0x18] sm:$0xff]  ;;  %v127_v17 = vadd.f32 %v120_v7, %v119_v4  ;;  %v122_v19 = vmul.f32 %v114_v13, %v43_v11  ;;  %v45_v22 = vld [vmem:[#allocation2 + $0x28] sm:$0xff]  ;;  %v86_v52 = vadd.s32 4294967288, %v81_v49  ;;  %p230_p2 = scmp.ne.s32.totalorder %s171_s6, %s229_s7  ;;  %p235_p4 = scmp.lt.s32.totalorder %s229_s7, %s229_s7 }
  0x2b   :  { %v64_v18 = vadd.f32 %v57_v9, %v56_v8  ;;  %v58_v20 = vmul.f32 %v50_v15, %v42_v10  ;;  %v115_v23 = vld [vmem:[#allocation5 + $0x60] sm:$0xff]  ;;  %v59_v24 = vmul.f32 %v51_v16, %v43_v11  ;;  %v116_v25 = vld [vmem:[#allocation5 + $0x68] sm:$0xff]  ;;  %v46_v32 = vld [vmem:[#allocation2 + $0x30] sm:$0xff]  ;;  %v93_v53 = vadd.s32 4294967280, %v81_v49 }
  0x2c   :  { %v123_v26 = vmul.f32 %v115_v23, %v44_v21  ;;  %v52_v27 = vld [vmem:[#allocation5 + $0x20] sm:$0xff]  ;;  %v53_v28 = vld [vmem:[#allocation5 + $0x28] sm:$0xff]  ;;  %128 = vadd.xlane.f32.xlu1 %v127_v17  ;;  %v130_v29 = vadd.f32 %v122_v19, %v121_v14  ;;  %v124_v30 = vmul.f32 %v116_v25, %v45_v22  ;;  %v47_v33 = vld [vmem:[#allocation2 + $0x38] sm:$0xff]  ;;  %v89_v57 = vsub.s32 %v86_v52, %v83_v54  ;;  %p236_p5 = por %p235_p4, %p234_p3 }
  0x2d   :  { %65 = vadd.xlane.f32.xlu0 %v64_v18  ;;  %v60_v31 = vmul.f32 %v52_v27, %v44_v21  ;;  %v117_v34 = vld [vmem:[#allocation5 + $0x70] sm:$0xff]  ;;  %v67_v35 = vadd.f32 %v59_v24, %v58_v20  ;;  %v61_v36 = vmul.f32 %v53_v28, %v45_v22  ;;  %v118_v37 = vld [vmem:[#allocation5 + $0x78] sm:$0xff]  ;;  %v100_v58 = vadd.s32 4294967272, %v81_v49 }
  0x2e   :  { %v54_v38 = vld [vmem:[#allocation5 + $0x30] sm:$0xff]  ;;  %v55_v39 = vld [vmem:[#allocation5 + $0x38] sm:$0xff]  ;;  %v133_v40 = vadd.f32 %v124_v30, %v123_v26  ;;  %v125_v41 = vmul.f32 %v117_v34, %v46_v32  ;;  %v126_v42 = vmul.f32 %v118_v37, %v47_v33  ;;  %v96_v59 = vsub.s32 %v93_v53, %v83_v54  ;;  %p237_p6 = pnand %p236_p5, %p230_p2 }
  0x2f   :  { %v70_v43 = vadd.f32 %v61_v36, %v60_v31  ;;  %v62_v44 = vmul.f32 %v54_v38, %v46_v32  ;;  %v63_v45 = vmul.f32 %v55_v39, %v47_v33  ;;  %v84_v60 = vsub.s32 %v81_v49, %v83_v54 }
  0x30   :  { %131 = vadd.xlane.f32.xlu1 %v130_v29  ;;  %v136_v46 = vadd.f32 %v126_v42, %v125_v41  ;;  %v103_v1 = vsub.s32 %v100_v58, %v83_v54 }
  0x31   :  { %68 = vadd.xlane.f32.xlu0 %v67_v35  ;;  %v73_v47 = vadd.f32 %v63_v45, %v62_v44 }
  0x34   :  { %134 = vadd.xlane.f32.xlu1 %v133_v40 }
  0x35   :  { %71 = vadd.xlane.f32.xlu0 %v70_v43 }
  0x38   :  { %137 = vadd.xlane.f32.xlu1 %v136_v46 }
  0x39   :  { %74 = vadd.xlane.f32.xlu0 %v73_v47 }
  0xb9   :  { %v129_v50 = vpop.xlane.xlu1 %128 }
  0xba   :  { %v66_v51 = vpop.xlane.xlu0 %65  ;;  %v146_v4 = vrot.slane %v129_v50, %v84_v60 }
  0xbb   :  { %v85_v5 = vrot.slane %v66_v51, %v84_v60 }
  0xbd   :  { %v132_v55 = vpop.xlane.xlu1 %131 }
  0xbe   :  { %v69_v56 = vpop.xlane.xlu0 %68  ;;  %v150_v63 = vrot.slane %v132_v55, %v89_v57 }
  0xbf   :  { %v90_v0 = vrot.slane %v69_v56, %v89_v57 }
  0xc0   :  { %v151_v8 = vsel %vm91_vm0, %v150_v63, %v146_v4 }
  0xc1   :  { %v135_v61 = vpop.xlane.xlu1 %134  ;;  %v92_v9 = vsel %vm91_vm0, %v90_v0, %v85_v5 }
  0xc2   :  { %v72_v62 = vpop.xlane.xlu0 %71  ;;  %v155_v2 = vrot.slane %v135_v61, %v96_v59 }
  0xc3   :  { %v97_v3 = vrot.slane %v72_v62, %v96_v59 }
  0xc4   :  { %v156_v12 = vsel %vm98_vm1, %v155_v2, %v151_v8 }
  0xc5   :  { %v138_v6 = vpop.xlane.xlu1 %137  ;;  %v99_v13 = vsel %vm98_vm1, %v97_v3, %v92_v9 }
  0xc6   :  { %v75_v7 = vpop.xlane.xlu0 %74  ;;  %v160_v10 = vrot.slane %v138_v6, %v103_v1 }
  0xc7   :  { %v104_v11 = vrot.slane %v75_v7, %v103_v1 }
  0xc8   :  { %v161_v14 = vsel %vm105_vm2, %v160_v10, %v156_v12 }
  0xc9   :  { %v106_v15 = vsel %vm105_vm2, %v104_v11, %v99_v13  ;;  %163 = vst.msk [vmem:[#allocation7 + $0x1] sm:$0x1] %vm108_vm3, %v161_v14 }
  0xca   :  { %109 = vst.msk [vmem:[#allocation7] sm:$0x1] %vm108_vm3, %v106_v15 }
  0xcb   :  { %240 = shalt.err (!%p237_p6)
}
  0xcc   :  { %s241_s10 = scalar_lea.hbm %s315_s2, 32 }
  0xcd   :  { %p242_p7 = scmp.ne.s32.totalorder %s315_s2, %s241_s10  ;;  %p245_p8 = scmp.lt.u32.totalorder %s241_s10, %s315_s2 }
  0xcf   :  { %p247_p9 = pnand %p245_p8, %p242_p7 }
  0xd1   :  { %250 = shalt.err (!%p247_p9)
}
  0xd2   :  { %173 = dma.vmem_to_hbm [thread:$0]  %s171_s6, 32, %s315_s2, [#allocation4]  }
  0xd3   :  { %255 = dma.done.wait [#allocation4], 32  }
  0xd4   :  { %256 = vsyncadd [#allocation4], 4294967264 }
  0xd5   :  { %177 = vsyncpa [#allocation3], 1 }
  0xd6   :  { %178 = vsyncpa [#allocation6], 1 }
  0xd7   :  { %179 = vsyncpa [#allocation4], 1 }

</bundles_post_ra>
